<compile_context>
chip_gen: v7x
topology: tpu7x:2x2x1
jax: 0.10.0
libtpu: 0.0.40
codegen_flags: <defaults>
</compile_context>

<pallas_src>
import math
from functools import partial

import jax
import jax.numpy as jnp
from jax.experimental import pallas as pl
from jax.experimental.pallas import tpu as pltpu


def _round_up(x, m):
    return ((x + m - 1) // m) * m


def _conv3x3_kernel(H, W, THW, PAD, BH, Cin,
                    x_ref, col_ref, above_ref, below_ref, w_ref, b_ref,
                    o_ref, e_ref, p_ref):
    """One (batch, row-tile) block of a 3x3 stride-1 'same' convolution.

    x_ref     : (1, Cin, THW)       f32  flattened main tile of the input
    col_ref   : (1, THW)            i32  pixel % W for every output column
    above_ref : (1, Cin, BH)        f32  BH flattened elements ending at tile start
    below_ref : (1, Cin, BH)        f32  BH flattened elements starting at tile end
    w_ref     : (Cout, 9*Cin)       bf16 tap-major conv weights
    b_ref     : (Cout, 1)           f32  bias
    o_ref     : (1, Cout, THW)      f32  output tile (flattened NCHW)
    e_ref     : (Cin, THW + 2*PAD)  bf16 scratch: tile + left/right halo
    p_ref     : (9*Cin, THW)        bf16 scratch: im2col patches built in VMEM
    """
    # --- Assemble the extended window in VMEM (input read from HBM only once).
    e_ref[:, PAD:PAD + THW] = x_ref[0].astype(jnp.bfloat16)
    e_ref[:, :PAD] = above_ref[0, :, BH - PAD:].astype(jnp.bfloat16)
    e_ref[:, PAD + THW:] = below_ref[0, :, :PAD].astype(jnp.bfloat16)

    h = pl.program_id(1)
    lane = jax.lax.broadcasted_iota(jnp.int32, (1, THW), 1)
    mg = lane + h * THW                       # global flattened pixel index
    col = col_ref[...]                        # pixel column (pixel % W)

    # Border masks (top / bottom rows, left / right columns).  These also kill
    # any stale data read through clamped halo blocks or partial tail blocks.
    row_ok = [mg >= W, None, mg < (H * W - W)]      # dy = 0, 1, 2
    col_ok = [col >= 1, None, col < (W - 1)]        # dx = 0, 1, 2

    # --- Build the (9*Cin, THW) patch matrix (tap-major rows: k = (dy*3+dx)*Cin + c).
    for dy in range(3):
        for dx in range(3):
            k = dy * 3 + dx
            off = PAD + (dy - 1) * W + (dx - 1)       # static lane offset
            tap = e_ref[:, off:off + THW]             # (Cin, THW)
            ok = row_ok[dy]
            if col_ok[dx] is not None:
                ok = col_ok[dx] if ok is None else (ok & col_ok[dx])
            if ok is not None:
                tap = jnp.where(ok, tap, 0)           # select: NaN-safe zeroing
            p_ref[k * Cin:(k + 1) * Cin, :] = tap

    # --- Single MXU GEMM, fp32 accumulation, fp32 bias, cast on store.
    acc = jnp.dot(w_ref[...], p_ref[...], preferred_element_type=jnp.float32)
    acc = acc + b_ref[...]
    o_ref[0] = acc.astype(o_ref.dtype)


def _choose_tile_rows(H, W, Cin, Cout, n_batch):
    """Pick the row-tile size (multiple of the halo alignment unit)."""
    BH = _round_up(W + 1, 128)                 # halo block size (lanes)
    th_step = BH // math.gcd(W, BH)            # rows per alignment unit
    # Per-column VMEM estimate (bytes): double-buffered in/out blocks + scratch.
    col_bytes = Cin * (2 * 4 + 2 + 18) + Cout * (2 * 4 + 8)
    budget = 7 * 1024 * 1024                   # keeps us under every gen's default scoped VMEM
    cap_rows = max(th_step, (budget // col_bytes) // W // th_step * th_step)
    tile_rows = min(cap_rows, _round_up(H, th_step))
    # v7x megacore: prefer >= 2 grid blocks total so both TensorCores get work.
    if n_batch * (-(-H // tile_rows)) < 2 and tile_rows > th_step:
        half = _round_up((H + 1) // 2, th_step)
        if half < tile_rows:
            tile_rows = max(th_step, half)
    return tile_rows, th_step, BH


@partial(jax.jit, static_argnames=("tile_rows",))
def conv3x3_same_pallas(x, weight_oihw, bias, tile_rows=None):
    """Equivalent of nn.Conv2d(Cin, Cout, kernel_size=3, padding=1, bias=True).

    x:           (N, Cin, H, W)   NCHW (consumed and produced as-is)
    weight_oihw: (Cout, Cin, 3, 3)
    bias:        (Cout,)
    returns      (N, Cout, H, W) in x.dtype
    """
    N, Cin, H, W = x.shape
    Cout = weight_oihw.shape[0]
    K = 9 * Cin
    Mtot = H * W

    auto_rows, th_step, BH = _choose_tile_rows(H, W, Cin, Cout, N)
    TH = auto_rows if tile_rows is None else _round_up(int(tile_rows), th_step)
    THW = TH * W
    if Mtot < BH:
        # TODO(synk): support feature maps smaller than one 128-lane halo block.
        raise NotImplementedError("H*W must be >= %d" % BH)
    HT = -(-Mtot // THW)               # number of row tiles (cdiv)
    PAD = W + 1                        # halo extent (elements) on each side
    R = THW // BH                      # halo-block stride per tile (exact)
    LASTB = -(-Mtot // BH) - 1         # last valid halo block index

    # Free reshape to flattened NCHW; no padding / im2col tensors in HBM.
    x_flat = x.reshape(N, Cin, Mtot)
    # Tap-major weight layout: k = (dy*3 + dx)*Cin + c.
    w2 = jnp.transpose(weight_oihw, (0, 2, 3, 1)).reshape(Cout, K).astype(jnp.bfloat16)
    b2 = bias.reshape(Cout, 1).astype(jnp.float32)
    col_ids = (jnp.arange(Mtot, dtype=jnp.int32) % W).reshape(1, Mtot)

    kernel = partial(_conv3x3_kernel, H, W, THW, PAD, BH, Cin)

    out = pl.pallas_call(
        kernel,
        out_shape=jax.ShapeDtypeStruct((N, Cout, Mtot), x.dtype),
        grid_spec=pltpu.PrefetchScalarGridSpec(
            num_scalar_prefetch=0,
            grid=(N, HT),
            in_specs=[
                # main tile of the flattened input
                pl.BlockSpec((1, Cin, THW), lambda n, h: (n, 0, h)),
                # per-column pixel%W indices (for left/right border masks)
                pl.BlockSpec((1, THW), lambda n, h: (0, h)),
                # halo just before the tile (clamped at the image start; masked)
                pl.BlockSpec((1, Cin, BH),
                             lambda n, h: (n, 0, jnp.maximum(h * R - 1, 0))),
                # halo just after the tile (clamped at the image end; masked)
                pl.BlockSpec((1, Cin, BH),
                             lambda n, h: (n, 0, jnp.minimum((h + 1) * R, LASTB))),
                pl.BlockSpec((Cout, K), lambda n, h: (0, 0)),
                pl.BlockSpec((Cout, 1), lambda n, h: (0, 0)),
            ],
            out_specs=pl.BlockSpec((1, Cout, THW), lambda n, h: (n, 0, h)),
            scratch_shapes=[
                pltpu.VMEM((Cin, THW + 2 * PAD), jnp.bfloat16),   # extended window
                pltpu.VMEM((K, THW), jnp.bfloat16),               # im2col patches
            ],
        ),
        # Per-step footprint is kept well under every generation's default
        # scoped-VMEM limit, so no vmem_limit_bytes override is needed.
        compiler_params=pltpu.CompilerParams(
            dimension_semantics=("parallel", "parallel")),
    )(x_flat, col_ids, x_flat, x_flat, w2, b2)

    return out.reshape(N, Cout, H, W)


class CoFix3DEncoderPallas:
    """JAX/Pallas re-implementation of CoFix3DEncoder (step=1, points-only path)."""

    def __init__(self, hidden_channel=32, in_channels_pts=24, step=1,
                 input_img=True, input_pts=True, key=None):
        self.step = step
        self.input_pts = input_pts
        self.input_img = input_img
        if key is None:
            key = jax.random.PRNGKey(0)
        kw, kb = jax.random.split(key)
        # build_conv_layer(bias='auto') with no norm layer => bias enabled.
        fan_in = in_channels_pts * 3 * 3
        bound = (1.0 / fan_in) ** 0.5
        self.conv_w = jax.random.uniform(
            kw, (hidden_channel, in_channels_pts, 3, 3),
            minval=-bound, maxval=bound, dtype=jnp.float32)
        self.conv_b = jax.random.uniform(
            kb, (hidden_channel,), minval=-bound, maxval=bound,
            dtype=jnp.float32)

    def forward(self, pts_feats, img_feats, img_metas):
        batch_size = len(img_metas)
        del batch_size  # only needed by the image branch
        if self.input_pts:
            new_pts_feat = conv3x3_same_pallas(
                pts_feats[0], self.conv_w, self.conv_b)
            if self.step == 1:
                return new_pts_feat, None
        # TODO(synk): step==2/3 need the external LiftSplatShoot camera lifting
        # module and the reduce_conv + BatchNorm2d fusion over its output; no
        # clean self-contained Pallas equivalent here.
        raise NotImplementedError("Only the step=1 (points-only) path is implemented.")

    __call__ = forward


def _reference_conv(x_nchw, weight_oihw, bias):
    out = jax.lax.conv_general_dilated(
        x_nchw, weight_oihw, window_strides=(1, 1), padding="SAME",
        dimension_numbers=("NCHW", "OIHW", "NCHW"),
        precision=jax.lax.Precision.HIGHEST)
    return out + bias[None, :, None, None]


if __name__ == "__main__":
    key = jax.random.PRNGKey(0)
    k_in, k_mod, k2x, k2w, k2b = jax.random.split(key, 5)

    # ---- Primary config (module's step=1 points-only path, small shapes) ----
    N, Cin, H, W = 2, 24, 16, 16
    hidden = 32

    pts_feat0 = jax.random.normal(k_in, (N, Cin, H, W), dtype=jnp.float32)
    pts_feats = [pts_feat0]
    img_feats = [None]          # unused in the step=1 path
    img_metas = [{}, {}]        # only len() is used in the step=1 path

    encoder = CoFix3DEncoderPallas(hidden_channel=hidden, in_channels_pts=Cin,
                                   step=1, key=k_mod)
    out, aux = encoder(pts_feats, img_feats, img_metas)
    out = jax.block_until_ready(out)

    assert aux is None
    assert out.shape == (N, hidden, H, W), out.shape

    # Tight check: reference on bf16-quantized operands (same operand precision
    # as the kernel's MXU path), fp32 accumulation in both.
    x_q = pts_feat0.astype(jnp.bfloat16).astype(jnp.float32)
    w_q = encoder.conv_w.astype(jnp.bfloat16).astype(jnp.float32)
    ref_q = jax.block_until_ready(_reference_conv(x_q, w_q, encoder.conv_b))
    assert jnp.allclose(out, ref_q, atol=2e-3, rtol=2e-3), \
        float(jnp.max(jnp.abs(out - ref_q)))

    # Loose check against the exact fp32 reference (bf16 operand rounding only).
    ref = jax.block_until_ready(
        _reference_conv(pts_feat0, encoder.conv_w, encoder.conv_b))
    assert jnp.allclose(out, ref, atol=1e-1, rtol=1e-1), \
        float(jnp.max(jnp.abs(out - ref)))

    # ---- Secondary config: exercises multi row-tile halos + partial tail blocks.
    N2, Ci2, Co2, H2, W2 = 1, 8, 16, 40, 24
    x2 = jax.random.normal(k2x, (N2, Ci2, H2, W2), dtype=jnp.float32)
    bound2 = (1.0 / (Ci2 * 9)) ** 0.5
    w2_ = jax.random.uniform(k2w, (Co2, Ci2, 3, 3), minval=-bound2, maxval=bound2,
                             dtype=jnp.float32)
    b2_ = jax.random.uniform(k2b, (Co2,), minval=-bound2, maxval=bound2,
                             dtype=jnp.float32)
    out2 = jax.block_until_ready(conv3x3_same_pallas(x2, w2_, b2_, tile_rows=16))
    ref2_q = jax.block_until_ready(_reference_conv(
        x2.astype(jnp.bfloat16).astype(jnp.float32),
        w2_.astype(jnp.bfloat16).astype(jnp.float32), b2_))
    assert out2.shape == (N2, Co2, H2, W2), out2.shape
    assert jnp.allclose(out2, ref2_q, atol=2e-3, rtol=2e-3), \
        float(jnp.max(jnp.abs(out2 - ref2_q)))

    print("KERNEL_OK")
</pallas_src>

<mosaic_0001>
module attributes {stable_mosaic.version = 11 : i64} {
  func.func @_conv3x3_kernel(%arg0: i32, %arg1: i32, %arg2: memref<1x24x256xf32, #tpu.memory_space<vmem>>, %arg3: memref<1x256xi32, #tpu.memory_space<vmem>>, %arg4: memref<1x24x128xf32, #tpu.memory_space<vmem>>, %arg5: memref<1x24x128xf32, #tpu.memory_space<vmem>>, %arg6: memref<32x216xbf16, #tpu.memory_space<vmem>>, %arg7: memref<32x1xf32, #tpu.memory_space<vmem>>, %arg8: memref<1x32x256xf32, #tpu.memory_space<vmem>>, %arg9: memref<24x290xbf16, #tpu.memory_space<vmem>>, %arg10: memref<216x256xbf16, #tpu.memory_space<vmem>>) attributes {dimension_semantics = [#tpu.dimension_semantics<parallel>, #tpu.dimension_semantics<parallel>], iteration_bounds = array<i64: 2, 1>, scalar_prefetch = 0 : i64, scratch_operands = 2 : i64, tpu.core_type = #tpu.core_type<tc>, window_params = [{transform_indices = @transform_0, window_bounds = array<i64: 1, 24, 256>}, {transform_indices = @transform_1, window_bounds = array<i64: 1, 256>}, {transform_indices = @transform_2, window_bounds = array<i64: 1, 24, 128>}, {transform_indices = @transform_3, window_bounds = array<i64: 1, 24, 128>}, {pipeline_mode = #tpu.pipeline_mode<synchronous>, transform_indices = @transform_4, window_bounds = array<i64: 32, 216>}, {pipeline_mode = #tpu.pipeline_mode<synchronous>, transform_indices = @transform_5, window_bounds = array<i64: 32, 1>}, {transform_indices = @transform_6, window_bounds = array<i64: 1, 32, 256>}]} {
    %c0 = arith.constant 0 : index
    %c0_0 = arith.constant 0 : index
    %c0_1 = arith.constant 0 : index
    %0 = vector.load %arg2[%c0, %c0_0, %c0_1] : memref<1x24x256xf32, #tpu.memory_space<vmem>>, vector<1x24x256xf32>
    %1 = vector.shape_cast %0 : vector<1x24x256xf32> to vector<24x256xf32>
    %2 = arith.truncf %1 : vector<24x256xf32> to vector<24x256xbf16>
    %c0_2 = arith.constant 0 : index
    %c17 = arith.constant 17 : index
    %3 = vector.load %arg9[%c0_2, %c17] : memref<24x290xbf16, #tpu.memory_space<vmem>>, vector<24x256xbf16>
    tpu.vector_store %arg9[%c0_2, %c17], %2 {strides = array<i32>} : memref<24x290xbf16, #tpu.memory_space<vmem>>, vector<24x256xbf16>,
    %c0_3 = arith.constant 0 : index
    %c0_4 = arith.constant 0 : index
    %c111 = arith.constant 111 : index
    %4 = vector.load %arg4[%c0_3, %c0_4, %c111] : memref<1x24x128xf32, #tpu.memory_space<vmem>>, vector<1x24x17xf32>
    %5 = vector.shape_cast %4 : vector<1x24x17xf32> to vector<24x17xf32>
    %6 = arith.truncf %5 : vector<24x17xf32> to vector<24x17xbf16>
    %c0_5 = arith.constant 0 : index
    %c0_6 = arith.constant 0 : index
    %7 = vector.load %arg9[%c0_5, %c0_6] : memref<24x290xbf16, #tpu.memory_space<vmem>>, vector<24x17xbf16>
    tpu.vector_store %arg9[%c0_5, %c0_6], %6 {strides = array<i32>} : memref<24x290xbf16, #tpu.memory_space<vmem>>, vector<24x17xbf16>,
    %c0_7 = arith.constant 0 : index
    %c0_8 = arith.constant 0 : index
    %c0_9 = arith.constant 0 : index
    %8 = vector.load %arg5[%c0_7, %c0_8, %c0_9] : memref<1x24x128xf32, #tpu.memory_space<vmem>>, vector<1x24x17xf32>
    %9 = vector.shape_cast %8 : vector<1x24x17xf32> to vector<24x17xf32>
    %10 = arith.truncf %9 : vector<24x17xf32> to vector<24x17xbf16>
    %c0_10 = arith.constant 0 : index
    %c273 = arith.constant 273 : index
    %11 = vector.load %arg9[%c0_10, %c273] : memref<24x290xbf16, #tpu.memory_space<vmem>>, vector<24x17xbf16>
    tpu.vector_store %arg9[%c0_10, %c273], %10 {strides = array<i32>} : memref<24x290xbf16, #tpu.memory_space<vmem>>, vector<24x17xbf16>,
    %12 = tpu.iota {dimensions = array<i32: 1>} : vector<1x256xi32>
    %c256_i32 = arith.constant 256 : i32
    %13 = arith.muli %arg1, %c256_i32 : i32
    %14 = vector.broadcast %13 : i32 to vector<1x256xi32>
    %15 = arith.addi %12, %14 : vector<1x256xi32>
    %c0_11 = arith.constant 0 : index
    %c0_12 = arith.constant 0 : index
    %16 = vector.load %arg3[%c0_11, %c0_12] : memref<1x256xi32, #tpu.memory_space<vmem>>, vector<1x256xi32>
    %c16_i32 = arith.constant 16 : i32
    %17 = vector.broadcast %c16_i32 : i32 to vector<1x256xi32>
    %18 = arith.cmpi sge, %15, %17 : vector<1x256xi32>
    %c240_i32 = arith.constant 240 : i32
    %19 = vector.broadcast %c240_i32 : i32 to vector<1x256xi32>
    %20 = arith.cmpi slt, %15, %19 : vector<1x256xi32>
    %c1_i32 = arith.constant 1 : i32
    %21 = vector.broadcast %c1_i32 : i32 to vector<1x256xi32>
    %22 = arith.cmpi sge, %16, %21 : vector<1x256xi32>
    %c15_i32 = arith.constant 15 : i32
    %23 = vector.broadcast %c15_i32 : i32 to vector<1x256xi32>
    %24 = arith.cmpi slt, %16, %23 : vector<1x256xi32>
    %c0_13 = arith.constant 0 : index
    %c0_14 = arith.constant 0 : index
    %25 = vector.load %arg9[%c0_13, %c0_14] : memref<24x290xbf16, #tpu.memory_space<vmem>>, vector<24x256xbf16>
    %26 = arith.andi %18, %22 : vector<1x256xi1>
    %c0_i32 = arith.constant 0 : i32
    %27 = arith.sitofp %c0_i32 : i32 to bf16
    %28 = vector.shape_cast %26 : vector<1x256xi1> to vector<1x256xi1>
    %29 = vector.broadcast %28 : vector<1x256xi1> to vector<24x256xi1>
    %30 = vector.broadcast %27 : bf16 to vector<24x256xbf16>
    %31 = arith.select %29, %25, %30 : vector<24x256xi1>, vector<24x256xbf16>
    %c0_15 = arith.constant 0 : index
    %c0_16 = arith.constant 0 : index
    %32 = vector.load %arg10[%c0_15, %c0_16] : memref<216x256xbf16, #tpu.memory_space<vmem>>, vector<24x256xbf16>
    tpu.vector_store %arg10[%c0_15, %c0_16], %31 {strides = array<i32>} : memref<216x256xbf16, #tpu.memory_space<vmem>>, vector<24x256xbf16>,
    %c0_17 = arith.constant 0 : index
    %c1 = arith.constant 1 : index
    %33 = vector.load %arg9[%c0_17, %c1] : memref<24x290xbf16, #tpu.memory_space<vmem>>, vector<24x256xbf16>
    %c0_i32_18 = arith.constant 0 : i32
    %34 = arith.sitofp %c0_i32_18 : i32 to bf16
    %35 = vector.shape_cast %18 : vector<1x256xi1> to vector<1x256xi1>
    %36 = vector.broadcast %35 : vector<1x256xi1> to vector<24x256xi1>
    %37 = vector.broadcast %34 : bf16 to vector<24x256xbf16>
    %38 = arith.select %36, %33, %37 : vector<24x256xi1>, vector<24x256xbf16>
    %c24 = arith.constant 24 : index
    %c0_19 = arith.constant 0 : index
    %39 = vector.load %arg10[%c24, %c0_19] : memref<216x256xbf16, #tpu.memory_space<vmem>>, vector<24x256xbf16>
    tpu.vector_store %arg10[%c24, %c0_19], %38 {strides = array<i32>} : memref<216x256xbf16, #tpu.memory_space<vmem>>, vector<24x256xbf16>,
    %c0_20 = arith.constant 0 : index
    %c2 = arith.constant 2 : index
    %40 = vector.load %arg9[%c0_20, %c2] : memref<24x290xbf16, #tpu.memory_space<vmem>>, vector<24x256xbf16>
    %41 = arith.andi %18, %24 : vector<1x256xi1>
    %c0_i32_21 = arith.constant 0 : i32
    %42 = arith.sitofp %c0_i32_21 : i32 to bf16
    %43 = vector.shape_cast %41 : vector<1x256xi1> to vector<1x256xi1>
    %44 = vector.broadcast %43 : vector<1x256xi1> to vector<24x256xi1>
    %45 = vector.broadcast %42 : bf16 to vector<24x256xbf16>
    %46 = arith.select %44, %40, %45 : vector<24x256xi1>, vector<24x256xbf16>
    %c48 = arith.constant 48 : index
    %c0_22 = arith.constant 0 : index
    %47 = vector.load %arg10[%c48, %c0_22] : memref<216x256xbf16, #tpu.memory_space<vmem>>, vector<24x256xbf16>
    tpu.vector_store %arg10[%c48, %c0_22], %46 {strides = array<i32>} : memref<216x256xbf16, #tpu.memory_space<vmem>>, vector<24x256xbf16>,
    %c0_23 = arith.constant 0 : index
    %c16 = arith.constant 16 : index
    %48 = vector.load %arg9[%c0_23, %c16] : memref<24x290xbf16, #tpu.memory_space<vmem>>, vector<24x256xbf16>
    %c0_i32_24 = arith.constant 0 : i32
    %49 = arith.sitofp %c0_i32_24 : i32 to bf16
    %50 = vector.shape_cast %22 : vector<1x256xi1> to vector<1x256xi1>
    %51 = vector.broadcast %50 : vector<1x256xi1> to vector<24x256xi1>
    %52 = vector.broadcast %49 : bf16 to vector<24x256xbf16>
    %53 = arith.select %51, %48, %52 : vector<24x256xi1>, vector<24x256xbf16>
    %c72 = arith.constant 72 : index
    %c0_25 = arith.constant 0 : index
    %54 = vector.load %arg10[%c72, %c0_25] : memref<216x256xbf16, #tpu.memory_space<vmem>>, vector<24x256xbf16>
    tpu.vector_store %arg10[%c72, %c0_25], %53 {strides = array<i32>} : memref<216x256xbf16, #tpu.memory_space<vmem>>, vector<24x256xbf16>,
    %c0_26 = arith.constant 0 : index
    %c17_27 = arith.constant 17 : index
    %55 = vector.load %arg9[%c0_26, %c17_27] : memref<24x290xbf16, #tpu.memory_space<vmem>>, vector<24x256xbf16>
    %c96 = arith.constant 96 : index
    %c0_28 = arith.constant 0 : index
    %56 = vector.load %arg10[%c96, %c0_28] : memref<216x256xbf16, #tpu.memory_space<vmem>>, vector<24x256xbf16>
    tpu.vector_store %arg10[%c96, %c0_28], %55 {strides = array<i32>} : memref<216x256xbf16, #tpu.memory_space<vmem>>, vector<24x256xbf16>,
    %c0_29 = arith.constant 0 : index
    %c18 = arith.constant 18 : index
    %57 = vector.load %arg9[%c0_29, %c18] : memref<24x290xbf16, #tpu.memory_space<vmem>>, vector<24x256xbf16>
    %c0_i32_30 = arith.constant 0 : i32
    %58 = arith.sitofp %c0_i32_30 : i32 to bf16
    %59 = vector.shape_cast %24 : vector<1x256xi1> to vector<1x256xi1>
    %60 = vector.broadcast %59 : vector<1x256xi1> to vector<24x256xi1>
    %61 = vector.broadcast %58 : bf16 to vector<24x256xbf16>
    %62 = arith.select %60, %57, %61 : vector<24x256xi1>, vector<24x256xbf16>
    %c120 = arith.constant 120 : index
    %c0_31 = arith.constant 0 : index
    %63 = vector.load %arg10[%c120, %c0_31] : memref<216x256xbf16, #tpu.memory_space<vmem>>, vector<24x256xbf16>
    tpu.vector_store %arg10[%c120, %c0_31], %62 {strides = array<i32>} : memref<216x256xbf16, #tpu.memory_space<vmem>>, vector<24x256xbf16>,
    %c0_32 = arith.constant 0 : index
    %c32 = arith.constant 32 : index
    %64 = vector.load %arg9[%c0_32, %c32] : memref<24x290xbf16, #tpu.memory_space<vmem>>, vector<24x256xbf16>
    %65 = arith.andi %20, %22 : vector<1x256xi1>
    %c0_i32_33 = arith.constant 0 : i32
    %66 = arith.sitofp %c0_i32_33 : i32 to bf16
    %67 = vector.shape_cast %65 : vector<1x256xi1> to vector<1x256xi1>
    %68 = vector.broadcast %67 : vector<1x256xi1> to vector<24x256xi1>
    %69 = vector.broadcast %66 : bf16 to vector<24x256xbf16>
    %70 = arith.select %68, %64, %69 : vector<24x256xi1>, vector<24x256xbf16>
    %c144 = arith.constant 144 : index
    %c0_34 = arith.constant 0 : index
    %71 = vector.load %arg10[%c144, %c0_34] : memref<216x256xbf16, #tpu.memory_space<vmem>>, vector<24x256xbf16>
    tpu.vector_store %arg10[%c144, %c0_34], %70 {strides = array<i32>} : memref<216x256xbf16, #tpu.memory_space<vmem>>, vector<24x256xbf16>,
    %c0_35 = arith.constant 0 : index
    %c33 = arith.constant 33 : index
    %72 = vector.load %arg9[%c0_35, %c33] : memref<24x290xbf16, #tpu.memory_space<vmem>>, vector<24x256xbf16>
    %c0_i32_36 = arith.constant 0 : i32
    %73 = arith.sitofp %c0_i32_36 : i32 to bf16
    %74 = vector.shape_cast %20 : vector<1x256xi1> to vector<1x256xi1>
    %75 = vector.broadcast %74 : vector<1x256xi1> to vector<24x256xi1>
    %76 = vector.broadcast %73 : bf16 to vector<24x256xbf16>
    %77 = arith.select %75, %72, %76 : vector<24x256xi1>, vector<24x256xbf16>
    %c168 = arith.constant 168 : index
    %c0_37 = arith.constant 0 : index
    %78 = vector.load %arg10[%c168, %c0_37] : memref<216x256xbf16, #tpu.memory_space<vmem>>, vector<24x256xbf16>
    tpu.vector_store %arg10[%c168, %c0_37], %77 {strides = array<i32>} : memref<216x256xbf16, #tpu.memory_space<vmem>>, vector<24x256xbf16>,
    %c0_38 = arith.constant 0 : index
    %c34 = arith.constant 34 : index
    %79 = vector.load %arg9[%c0_38, %c34] : memref<24x290xbf16, #tpu.memory_space<vmem>>, vector<24x256xbf16>
    %80 = arith.andi %20, %24 : vector<1x256xi1>
    %c0_i32_39 = arith.constant 0 : i32
    %81 = arith.sitofp %c0_i32_39 : i32 to bf16
    %82 = vector.shape_cast %80 : vector<1x256xi1> to vector<1x256xi1>
    %83 = vector.broadcast %82 : vector<1x256xi1> to vector<24x256xi1>
    %84 = vector.broadcast %81 : bf16 to vector<24x256xbf16>
    %85 = arith.select %83, %79, %84 : vector<24x256xi1>, vector<24x256xbf16>
    %c192 = arith.constant 192 : index
    %c0_40 = arith.constant 0 : index
    %86 = vector.load %arg10[%c192, %c0_40] : memref<216x256xbf16, #tpu.memory_space<vmem>>, vector<24x256xbf16>
    tpu.vector_store %arg10[%c192, %c0_40], %85 {strides = array<i32>} : memref<216x256xbf16, #tpu.memory_space<vmem>>, vector<24x256xbf16>,
    %c0_41 = arith.constant 0 : index
    %c0_42 = arith.constant 0 : index
    %87 = vector.load %arg6[%c0_41, %c0_42] : memref<32x216xbf16, #tpu.memory_space<vmem>>, vector<32x216xbf16>
    %c0_43 = arith.constant 0 : index
    %c0_44 = arith.constant 0 : index
    %88 = vector.load %arg10[%c0_43, %c0_44] : memref<216x256xbf16, #tpu.memory_space<vmem>>, vector<216x256xbf16>
    %cst = arith.constant dense<0.000000e+00> : vector<32x256xf32>
    %89 = tpu.matmul %87, %88, %cst {dimension_numbers = #tpu.dot_dimension_numbers<[1], [0], [0], [1], [0, 0, 1, 1], [], []>} : vector<32x216xbf16>, vector<216x256xbf16>, vector<32x256xf32> -> vector<32x256xf32>
    %c0_45 = arith.constant 0 : index
    %c0_46 = arith.constant 0 : index
    %90 = vector.load %arg7[%c0_45, %c0_46] : memref<32x1xf32, #tpu.memory_space<vmem>>, vector<32x1xf32>
    %91 = vector.broadcast %90 : vector<32x1xf32> to vector<32x256xf32>
    %92 = arith.addf %89, %91 : vector<32x256xf32>
    %c0_47 = arith.constant 0 : index
    %c0_48 = arith.constant 0 : index
    %c0_49 = arith.constant 0 : index
    %93 = vector.load %arg8[%c0_47, %c0_48, %c0_49] : memref<1x32x256xf32, #tpu.memory_space<vmem>>, vector<1x32x256xf32>
    %94 = vector.shape_cast %93 : vector<1x32x256xf32> to vector<32x256xf32>
    %95 = vector.shape_cast %92 : vector<32x256xf32> to vector<1x32x256xf32>
    tpu.vector_store %arg8[%c0_47, %c0_48, %c0_49], %95 {strides = array<i32>} : memref<1x32x256xf32, #tpu.memory_space<vmem>>, vector<1x32x256xf32>,
    return
  }
  func.func @transform_0(%arg0: i32, %arg1: i32) -> (i32, i32, i32) {
    %c0_i32 = arith.constant 0 : i32
    %c0_i32_0 = arith.constant 0 : i32
    return %arg0, %c0_i32, %arg1 : i32, i32, i32
  }
  func.func @transform_1(%arg0: i32, %arg1: i32) -> (i32, i32) {
    %c0_i32 = arith.constant 0 : i32
    %c0_i32_0 = arith.constant 0 : i32
    return %c0_i32, %arg1 : i32, i32
  }
  func.func @transform_2(%arg0: i32, %arg1: i32) -> (i32, i32, i32) {
    %c2_i32 = arith.constant 2 : i32
    %0 = arith.muli %arg1, %c2_i32 : i32
    %c1_i32 = arith.constant 1 : i32
    %1 = arith.subi %0, %c1_i32 : i32
    %c0_i32 = arith.constant 0 : i32
    %2 = arith.maxsi %1, %c0_i32 : i32
    %c0_i32_0 = arith.constant 0 : i32
    %c0_i32_1 = arith.constant 0 : i32
    return %arg0, %c0_i32_0, %2 : i32, i32, i32
  }
  func.func @transform_3(%arg0: i32, %arg1: i32) -> (i32, i32, i32) {
    %c1_i32 = arith.constant 1 : i32
    %0 = arith.addi %arg1, %c1_i32 : i32
    %c2_i32 = arith.constant 2 : i32
    %1 = arith.muli %0, %c2_i32 : i32
    %c1_i32_0 = arith.constant 1 : i32
    %2 = arith.minsi %1, %c1_i32_0 : i32
    %c0_i32 = arith.constant 0 : i32
    %c0_i32_1 = arith.constant 0 : i32
    return %arg0, %c0_i32, %2 : i32, i32, i32
  }
  func.func @transform_4(%arg0: i32, %arg1: i32) -> (i32, i32) {
    %c0_i32 = arith.constant 0 : i32
    %c0_i32_0 = arith.constant 0 : i32
    %c0_i32_1 = arith.constant 0 : i32
    return %c0_i32, %c0_i32_0 : i32, i32
  }
  func.func @transform_5(%arg0: i32, %arg1: i32) -> (i32, i32) {
    %c0_i32 = arith.constant 0 : i32
    %c0_i32_0 = arith.constant 0 : i32
    %c0_i32_1 = arith.constant 0 : i32
    return %c0_i32, %c0_i32_0 : i32, i32
  }
  func.func @transform_6(%arg0: i32, %arg1: i32) -> (i32, i32, i32) {
    %c0_i32 = arith.constant 0 : i32
    %c0_i32_0 = arith.constant 0 : i32
    return %arg0, %c0_i32, %arg1 : i32, i32, i32
  }
}

</mosaic_0001>

<bundles_post_ra>
// kernel: conv3x3_same_pallas.1
= control target key start
LH: loop header
LB: loop body
LE: loop exit
PB: predicated region body
PF: predicated region fallthrough
CT: control target
= control target key end

     0   :  { %s1829_s21 = smov 0   ;;  %s1831_s22 = smov 0   ;;  %s2283_s0 = inlined_call_operand.vmem [shape: f32[2,24,256], index: 0, kind: input, shape index: {}, may-alias: {0,2,3}]   ;;  %s2284_s1 = inlined_call_operand.vmem [shape: s32[1,256], index: 1, kind: input, shape index: {}]   ;;  %s2285_s2 = inlined_call_operand.vmem [shape: f32[2,24,256], index: 2, kind: input, shape index: {}, may-alias: {0,2,3}]   ;;  %s2286_s3 = inlined_call_operand.vmem [shape: f32[2,24,256], index: 3, kind: input, shape index: {}, may-alias: {0,2,3}]   ;;  %s2287_s4 = inlined_call_operand.vmem [shape: bf16[32,216], index: 4, kind: input, shape index: {}]   ;;  %s2288_s5 = inlined_call_operand.vmem [shape: f32[32,1], index: 5, kind: input, shape index: {}]   ;;  %s2289_s6 = inlined_call_operand.vmem [shape: f32[2,32,256], index: 6, kind: output, shape index: {}]  }
   0x1   :  { %s1833_s23 = smov 0   ;;  %s1835_s24 = smov 0  }
   0x2   :  { %s1837_s25 = smov 0  }
   0x3 LB: > { %s28_s26 = sadd.s32 1, %s1770_s24  ;;  %p106_p1 = scmp.ne.s32.totalorder %s1762_s22, %s1758_s21  ;;  %s1774_s25 = sphi %s1837_s25, %s16_s25   ;;  %s1770_s24 = sphi %s1835_s24, %s2322_s24   ;;  %s1766_s23 = sphi %s1833_s23, %s2321_s23   ;;  %s1762_s22 = sphi %s1831_s22, %s2320_s22   ;;  %s1758_s21 = sphi %s1829_s21, %s2319_s21  }
   0x4   : > { %p30_p0 = scmp.ge.s32.totalorder %s28_s26, 2  ;;  %p107_p2 = scmp.eq.s32.totalorder %s1774_s25, 0 }
   0x5   : > { %s99_s29 = sadd.s32 1, %s1762_s22  ;;  %p1570_p5 = scmp.ge.s32.totalorder %s1774_s25, 2 }
   0x6   : > { %s2324_s26 = smov (%p30_p0, %s28_s26), 0  ;;  %p1860_p3 = por %p107_p2, %p106_p1 }
   0x7   : > { %s94_s28 = ssub.s32 %s1770_s24, %s2324_s26  ;;  %252 = sbr.rel (%p1570_p5) target bundleno = 30 (0x1e), region = 28 }
   0x8   : > { %p97_p4 = scmp.eq.s32.totalorder %s94_s28, 0 }
   0xa   : > { %s1868_s30 = scalar_select %p97_p4, %s1762_s22, %s99_s29  }
   0xe   : > { %268 = sbr.rel (!%p1860_p3) target bundleno = 21 (0x15), region = 36  ;;  %s270_s7 = sand.u32 (%p1860_p3), 1, %s1762_s22  }
   0xf   : > { %s1664_s8 = smul.u32 (%p1860_p3), 48, %s1770_s24 }
  0x10   : > { %s1663_s9 = smul.u32 (%p1860_p3), 24, %s270_s7 }
  0x11   : > { %s280_s12 = scalar_lea.vmem (%p1860_p3), %s2285_s2, %s1664_s8 }
  0x12   : > { %v312_v0 = vld [vmem:[%s280_s12] sm:$0xff] (%p1860_p3)  ;;  %v314_v1 = vld [vmem:[%s280_s12 + $0x10] sm:$0xff] (%p1860_p3)  ;;  %s272_s13 = scalar_lea.vmem (%p1860_p3), [#allocation4], %s1663_s9 }
  0x13   : > { %v316_v2 = vld [vmem:[%s280_s12 + $0x20] sm:$0xff] (%p1860_p3)  ;;  %313 = vst [vmem:[%s272_s13] sm:$0xff] (%p1860_p3), %v312_v0  ;;  %315 = vst [vmem:[%s272_s13 + $0x8] sm:$0xff] (%p1860_p3), %v314_v1 }
  0x14   : > { %317 = vst [vmem:[%s272_s13 + $0x10] sm:$0xff] (%p1860_p3), %v316_v2 }
  0x15 PF: > { %323 = sbr.rel (!%p1860_p3) target bundleno = 30 (0x1e), region = 74  ;;  %s325_s14 = sand.u32 (%p1860_p3), 1, %s1762_s22  }
  0x16   : > { %s1665_s15 = smul.u32 (%p1860_p3), 24, %s325_s14 }
  0x17   : > { %s1669_s16 = smul.u32 (%p1860_p3), 48, %s1770_s24 }
  0x18   : > { %s327_s28 = scalar_lea.vmem (%p1860_p3), [#allocation5], %s1665_s15 }
  0x19   : > { %s1624_s17 = sadd.s32 (%p1860_p3), 8, %s1669_s16 }
  0x1a   : > { %s335_s20 = scalar_lea.vmem (%p1860_p3), %s2286_s3, %s1624_s17 }
  0x1b   : > { %v367_v3 = vld [vmem:[%s335_s20] sm:$0xff] (%p1860_p3)  ;;  %v369_v4 = vld [vmem:[%s335_s20 + $0x10] sm:$0xff] (%p1860_p3) }
  0x1c   : > { %v371_v5 = vld [vmem:[%s335_s20 + $0x20] sm:$0xff]  ;;  %368 = vst [vmem:[%s327_s28] sm:$0xff] %v367_v3  ;;  %370 = vst [vmem:[%s327_s28 + $0x8] sm:$0xff] %v369_v4 }
  0x1d   : > { %372 = vst [vmem:[%s327_s28 + $0x10] sm:$0xff] %v371_v5 }
  0x1e PF: > { %p1573_p6 = scmp.ge.s32.totalorder %s1774_s25, 1  ;;  %p377_p7 = scmp.lt.s32.totalorder %s1774_s25, 3 }
  0x20   : > { %p378_p8 = pnand %p1573_p6, %p377_p7 }
  0x21   : > { %s384_s27 = sand.u32 (!%p378_p8), 1, %s1758_s21   ;;  %v580_v6 = vlaneseq (!%p378_p8)  ;;  %v587_v7 = vld [vmem:[%s2284_s1] sm:$0x3] (!%p378_p8)  ;;  %p442_p9 = scmp.lt.s32.totalorder (!%p378_p8), %s1766_s23, 1  ;;  %v1776_v8 = vmov (!%p378_p8), 0   ;;  %vm1778_vm11 = vmmov (!%p378_p8), 1  }
  0x22   : > { %381 = sbr.rel (%p378_p8) target bundleno = 612 (0x264), region = 112  ;;  %vm593_vm0 = vcmp.lt.s32.totalorder (!%p378_p8), %v587_v7, 15  ;;  %1729 = vset.pattern.permute.xlu1 (!%p378_p8), %v1776_v8  ;;  %1728 = vset.pattern.permute.xlu0 (!%p378_p8), %v1776_v8  ;;  %vm592_vm1 = vcmp.ge.s32.totalorder (!%p378_p8), %v587_v7, 1  ;;  %s1777_s11 = smov (!%p378_p8), 17  }
  0x23   : > { %s1667_s8 = smul.u32 (!%p378_p8), 24, %s384_s27  ;;  %v599_v9 = vshrl.u32 (!%p378_p8), %v580_v6, 7  ;;  %v581_v10 = vand.u32 (!%p378_p8), 127, %v580_v6  ;;  %v698_v11 = vsel (!%p378_p8), %vm593_vm0, 1, %v1776_v8  ;;  %v597_v19 = vsel (!%p378_p8), %vm592_vm1, 1, %v1776_v8  ;;  %s1779_s15 = smov (!%p378_p8), 1  }
  0x24   : > { %s1780_s16 = smov (!%p378_p8), 16   ;;  %s1781_s17 = smov (!%p378_p8), 2  }
  0x25   : > { %s1895_s21 = scalar_lea.vmem (!%p378_p8), [#allocation5], %s1667_s8  ;;  %s1898_s9 = scalar_lea.vmem (!%p378_p8), [#allocation4], %s1667_s8  ;;  %v1905_v15 = vsub.s32 (!%p378_p8), 0, %v599_v9  ;;  %v604_v18 = vsub.s32 (!%p378_p8), 1, %v599_v9  ;;  %vm588_vm2 = vcmp.ge.s32.totalorder (!%p378_p8), %v581_v10, 16  ;;  %v1921_v25 = vadd.s32 (!%p378_p8), 128, %v581_v10 }
  0x26   : > { %v554_v12 = vld [vmem:[%s1895_s21] sm:$0xff] (!%p378_p8)  ;;  %v529_v13 = vld [vmem:[%s1898_s9] sm:$0xff] (!%p378_p8)  ;;  %v530_v14 = vld [vmem:[%s1898_s9 + $0x8] sm:$0xff] (!%p378_p8)  ;;  %s1782_s18 = smov (!%p378_p8), 32   ;;  %s1783_s19 = smov (!%p378_p8), 18  }
  0x27   : > { %v1632_v16 = vpack.c.bf16 (!%p378_p8), %v554_v12, %v554_v12  ;;  %v1629_v17 = vpack.c.bf16 (!%p378_p8), %v529_v13, %v529_v13  ;;  %v1910_v20 = vrot.slane (!%p378_p8), %v698_v11, %v1905_v15  ;;  %v1630_v21 = vpack.c.bf16 (!%p378_p8), %v530_v14, %v530_v14  ;;  %v555_v34 = vld [vmem:[%s1895_s21 + $0x8] sm:$0xff] (!%p378_p8)  ;;  %v531_v38 = vld [vmem:[%s1898_s9 + $0x10] sm:$0xff] (!%p378_p8)  ;;  %v556_v48 = vld [vmem:[%s1895_s21 + $0x10] sm:$0xff] (!%p378_p8)  ;;  %s1784_s20 = smov (!%p378_p8), 34   ;;  %s1785_s28 = smov (!%p378_p8), 33  }
  0x28   : > { %v1914_v22 = vrot.slane (!%p378_p8), %v698_v11, %v604_v18  ;;  %v601_v23 = vrot.slane (!%p378_p8), %v597_v19, %v1905_v15  ;;  %v605_v24 = vrot.slane (!%p378_p8), %v597_v19, %v604_v18  ;;  %vm591_vm6 = vcmp.lt.s32.totalorder (!%p378_p8), %v1921_v25, 240  ;;  %vm1951_vm12 = vmpackc.low (!%p378_p8), %vm1778_vm11, %vm588_vm2  ;;  %s1786_s27 = smov (!%p378_p8), 111   ;;  %s1787_s29 = smov (!%p378_p8), 127  }
  0x29   : > { %s2326_s23 = smov (!%p442_p9, %s1766_s23), 1  ;;  %567 = vrot.lane.b32.xlu0 %v1632_v16, %s1777_s11  ;;  %542 = vrot.lane.b32.xlu1 %v1629_v17, %s1777_s11  ;;  %vm707_vm3 = vcmp.ne.s32.totalorder %v1910_v20, 0  ;;  %v1633_v39 = vpack.c.bf16 %v555_v34, %v555_v34  ;;  %v1631_v45 = vpack.c.bf16 %v531_v38, %v531_v38  ;;  %v1634_v57 = vpack.c.bf16 %v556_v48, %v556_v48  ;;  %s1788_s7 = smov 126  }
  0x2a   : > { %s1668_s10 = smul.u32 48, %s2326_s23  ;;  %vm708_vm4 = vcmp.ne.s32.totalorder %v1914_v22, 0  ;;  %vm709_vm5 = vmand %vm588_vm2, %vm707_vm3  ;;  %vm606_vm7 = vcmp.ne.s32.totalorder %v601_v23, 0  ;;  %vm607_vm8 = vcmp.ne.s32.totalorder %v605_v24, 0  ;;  %vm781_vm13 = vcmp.eq.s32.totalorder %v601_v23, 1  ;;  %s1789_s8 = smov 112  }
  0x2b   : > { %v712_v35 = vsel %vm708_vm4, 1, %v1776_v8  ;;  %v711_v37 = vsel %vm709_vm5, 1, %v1776_v8  ;;  %vm608_vm9 = vmand %vm588_vm2, %vm606_vm7  ;;  %v946_v42 = vsel %vm606_vm7, 1, %v1776_v8  ;;  %v611_v44 = vsel %vm607_vm8, 1, %v1776_v8  ;;  %s1790_s21 = smov 110   ;;  %s1791_s9 = smov 96  }
  0x2c   : > { %s449_s14 = scalar_lea.vmem %s2283_s0, %s1668_s10  ;;  %v720_v40 = vrot.slane %v712_v35, %v1905_v15  ;;  %v716_v41 = vrot.slane %v711_v37, %v1905_v15  ;;  %vm945_vm10 = vmand %vm591_vm6, %vm607_vm8  ;;  %v610_v43 = vsel %vm608_vm9, 1, %v1776_v8  ;;  %vm782_vm14 = vcmp.eq.s32.totalorder %v605_v24, 1  ;;  %s1792_s10 = smov 95  }
  0x2d   : > { %v477_v26 = vld [vmem:[%s449_s14] sm:$0xff]  ;;  %v478_v27 = vld [vmem:[%s449_s14 + $0x8] sm:$0xff]  ;;  %v479_v28 = vld [vmem:[%s449_s14 + $0x10] sm:$0xff]  ;;  %544 = vrot.lane.b32.xlu1 %v1630_v21, %s1777_s11  ;;  %v947_v46 = vsel %vm945_vm10, 1, %v1776_v8  ;;  %v615_v47 = vrot.slane %v610_v43, %v1905_v15  ;;  %v619_v50 = vrot.slane %v611_v44, %v1905_v15  ;;  %v951_v51 = vrot.slane %v946_v42, %v1905_v15 }
  0x2e   : > { %v1626_v29 = vpack.c.bf16 %v478_v27, %v477_v26  ;;  %v480_v30 = vld [vmem:[%s449_s14 + $0x18] sm:$0xff]  ;;  %v481_v31 = vld [vmem:[%s449_s14 + $0x20] sm:$0xff]  ;;  %v482_v32 = vld [vmem:[%s449_s14 + $0x28] sm:$0xff]  ;;  %v955_v52 = vrot.slane %v947_v46, %v1905_v15  ;;  %v1080_v53 = vsel %vm707_vm3, 1, %v1776_v8  ;;  %vm1966_vm1 = vcmp.eq.s32.totalorder %v716_v41, 1 }
  0x2f   : > { %v1628_v33 = vpack.c.bf16 %v482_v32, %v481_v31  ;;  %v1627_v36 = vpack.c.bf16 %v480_v30, %v479_v28  ;;  %vm1079_vm15 = vmand %vm591_vm6, %vm708_vm4  ;;  %vm620_vm0 = vcmp.eq.s32.totalorder %v615_v47, 1  ;;  %vm1970_vm2 = vcmp.eq.s32.totalorder %v720_v40, 1 }
  0x30   : > { %500 = vrot.lane.b32.xlu0 %v1626_v29, %s1777_s11  ;;  %v1081_v56 = vsel %vm1079_vm15, 1, %v1776_v8  ;;  %vm621_vm5 = vcmp.eq.s32.totalorder %v619_v50, 1  ;;  %v640_v58 = vsel %vm1951_vm12, 65537, %v1776_v8  ;;  %vm783_vm3 = vmpackc.low %vm782_vm14, %vm781_vm13  ;;  %vm1989_vm8 = vcmp.eq.s32.totalorder %v951_v51, 1 }
  0x31   : > { %504 = vrot.lane.b32.xlu1 %v1628_v33, %s1777_s11  ;;  %vm1981_vm4 = vmpackc.low %vm621_vm5, %vm620_vm0  ;;  %vm1993_vm9 = vcmp.eq.s32.totalorder %v955_v52, 1  ;;  %v1085_v62 = vrot.slane %v1080_v53, %v1905_v15  ;;  %v1089_v63 = vrot.slane %v1081_v56, %v1905_v15  ;;  %vm884_vm10 = vcmp.eq.s32.totalorder %v1910_v20, 1 }
  0x32   : > { %vm723_vm7 = vmpackc.low %vm1970_vm2, %vm1966_vm1  ;;  %vm885_vm12 = vcmp.eq.s32.totalorder %v1914_v22, 1  ;;  %v784_v0 = vsel %vm783_vm3, 65537, %v1776_v8  ;;  %vm519_vm5 = vcmask 1043592   ;;  %vm520_vm3 = vcmask 1047556  }
  0x33   : > { %v724_v1 = vsel %vm723_vm7, 65537, %v1776_v8  ;;  %vm958_vm13 = vmpackc.low %vm1993_vm9, %vm1989_vm8  ;;  %vm1090_vm15 = vcmp.eq.s32.totalorder %v1085_v62, 1  ;;  %vm1091_vm0 = vcmp.eq.s32.totalorder %v1089_v63, 1  ;;  %vm509_vm7 = vcmask 138240   ;;  %v1735_v62 = vld [vmem:[%s2287_s4 + $0x14] ss:$8 sps:$4 sm:$0xff]  }
  0x34   : > { %502 = vrot.lane.b32.xlu0 %v1627_v36, %s1777_s11  ;;  %vm886_vm14 = vmpackc.low %vm885_vm12, %vm884_vm10  ;;  %v959_v2 = vsel %vm958_vm13, 65537, %v1776_v8  ;;  %vm523_vm8 = vcmask 134144   ;;  %vm644_vm9 = vcmask 7168   ;;  %vm728_vm13 = vcmask 15360  }
  0x35   : > { %569 = vrot.lane.b32.xlu1 %v1633_v39, %s1777_s11  ;;  %v887_v3 = vsel %vm886_vm14, 65537, %v1776_v8  ;;  %vm1092_vm1 = vmpackc.low %vm1091_vm0, %vm1090_vm15 }
  0x36   : > { %vm1020_vm2 = vmpackc.low %vm591_vm6, %vm1778_vm11  ;;  %v1093_v4 = vsel %vm1092_vm1, 65537, %v1776_v8  ;;  %vm576_vm11 = vcmask 273544  }
  0x37   : > { %v1021_v5 = vsel %vm1020_vm2, 65537, %v1776_v8  ;;  %vm2015_vm6 = vmor %vm520_vm3, %vm519_vm5  ;;  %vm891_vm2 = vcmask 146432  }
  0x38   : > { %546 = vrot.lane.b32.xlu0 %v1631_v45, %s1777_s11 }
  0x39   : > { %641 = vrot.lane.b32.xlu1 %v640_v58, %s1779_s15 }
  0x3c   : > { %571 = vrot.lane.b32.xlu0 %v1634_v57, %s1777_s11  ;;  %s1793_s11 = smov 94  }
  0x3d   : > { %785 = vrot.lane.b32.xlu1 %v784_v0, %s1780_s16 }
  0x40   : > { %725 = vrot.lane.b32.xlu0 %v724_v1, %s1781_s17 }
  0x41   : > { %960 = vrot.lane.b32.xlu1 %v959_v2, %s1782_s18 }
  0x44   : > { %888 = vrot.lane.b32.xlu0 %v887_v3, %s1783_s19 }
  0x45   : > { %1094 = vrot.lane.b32.xlu1 %v1093_v4, %s1784_s20 }
  0x48   : > { %1022 = vrot.lane.b32.xlu0 %v1021_v5, %s1785_s28 }
  0x9b   : > { %v568_v6 = vpop.permute.xlu0 %567  ;;  %v543_v7 = vpop.permute.xlu1 %542 }
  0x9f   : > { %v545_v9 = vpop.permute.xlu1 %544 }
  0xa2   : > { %v501_v10 = vpop.permute.xlu0 %500 }
  0xa3   : > { %v506_v12 = vrot.slane %v501_v10, 4  ;;  %v505_v13 = vpop.permute.xlu1 %504 }
  0xa4   : > { %v508_v15 = vrot.slane %v505_v13, 4 }
  0xa5   : > { %v510_v8 = vsel %vm509_vm7, %v506_v12, %v501_v10  ;;  %524 = vst.msk [vmem:[#allocation2 + $0x8] sm:$0xf] %vm523_vm8, %v506_v12 }
  0xa6   : > { %522 = vst.msk [vmem:[#allocation2] sm:$0xff] %vm2015_vm6, %v510_v8  ;;  %v503_v14 = vpop.permute.xlu0 %502  ;;  %v512_v17 = vsel %vm509_vm7, %v508_v15, %v505_v13 }
  0xa7   : > { %577 = vst.msk [vmem:[#allocation2 + $0x8] sm:$0xf] %vm576_vm11, %v568_v6  ;;  %v507_v16 = vrot.slane %v503_v14, 4  ;;  %v570_v19 = vpop.permute.xlu1 %569 }
  0xa8   : > { %551 = vst.msk [vmem:[#allocation2] sm:$0xf] %vm523_vm8, %v543_v7  ;;  %528 = vst.msk [vmem:[#allocation2 + $0x20] sm:$0xf] %vm523_vm8, %v508_v15 }
  0xa9   : > { %v511_v18 = vsel %vm509_vm7, %v507_v16, %v503_v14  ;;  %526 = vst.msk [vmem:[#allocation2 + $0x14] sm:$0xf] %vm523_vm8, %v507_v16  ;;  %vm963_vm7 = vcmask 261120  }
  0xaa   : > { %527 = vst.msk [vmem:[#allocation2 + $0x18] sm:$0xff] %vm2015_vm6, %v512_v17  ;;  %525 = vst.msk [vmem:[#allocation2 + $0xc] sm:$0xff] %vm2015_vm6, %v511_v18  ;;  %v547_v20 = vpop.permute.xlu0 %546 }
  0xab   : > { %578 = vst.msk [vmem:[#allocation2 + $0x14] sm:$0xf] %vm576_vm11, %v570_v19  ;;  %v642_v23 = vpop.permute.xlu1 %641 }
  0xac   : > { %552 = vst.msk [vmem:[#allocation2 + $0xc] sm:$0xf] %vm523_vm8, %v545_v9  ;;  %553 = vst.msk [vmem:[#allocation2 + $0x18] sm:$0xf] %vm523_vm8, %v547_v20  ;;  %v643_v25 = vrot.slane %v642_v23, 4 }
  0xae   : > { %v836_v21 = vld [vmem:[#allocation2 + $0x8] sm:$0xf]  ;;  %v572_v22 = vpop.permute.xlu0 %571  ;;  %v645_v32 = vsel %vm644_vm9, %v643_v25, %v642_v23  ;;  %vm2051_vm12 = vcmp.ne.s16.totalorder %v643_v25, 0 }
  0xaf   : > { %849 = vrot.lane.b32.xlu1 %v836_v21, %s1786_s27  ;;  %v2036_v24 = vld [vmem:[#allocation2] sm:$0xff]  ;;  %579 = vst.msk [vmem:[#allocation2 + $0x20] sm:$0xf] %vm576_vm11, %v572_v22  ;;  %vm646_vm10 = vcmp.ne.s16.totalorder %v645_v32, 0  ;;  %v630_v37 = vld [vmem:[#allocation2 + $0x8] sm:$0xf]  ;;  %v786_v50 = vpop.permute.xlu1 %785 }
  0xb0   : > { %847 = vrot.lane.b32.xlu0 %v2036_v24, %s1786_s27  ;;  %v623_v28 = vsel %vm1981_vm4, %v2036_v24, 0  ;;  %v649_v38 = vsel %vm2051_vm12, %v630_v37, 0  ;;  %v648_v39 = vsel %vm646_vm10, %v2036_v24, 0  ;;  %v693_v51 = vld [vmem:[#allocation2 + $0x8] sm:$0xf]  ;;  %v787_v54 = vrot.slane %v786_v50, 4 }
  0xb1   : > { %v776_v0 = vld [vmem:[#allocation2 + $0x8] sm:$0xf]  ;;  %vm1025_vm11 = vcmask 269312  }
  0xb2   : > { %v838_v26 = vld [vmem:[#allocation2 + $0x14] sm:$0xf]  ;;  %v726_v36 = vpop.permute.xlu0 %725  ;;  %vm2089_vm1 = vcmp.ne.s16.totalorder %v787_v54, 0  ;;  %v879_v13 = vld [vmem:[#allocation2 + $0x8] sm:$0xf] }
  0xb3   : > { %v2040_v27 = vld [vmem:[#allocation2 + $0xc] sm:$0xff]  ;;  %853 = vrot.lane.b32.xlu1 %v838_v26, %s1786_s27  ;;  %v2049_v34 = vld [vmem:[#allocation2 + $0x18] sm:$0xff]  ;;  %v632_v40 = vld [vmem:[#allocation2 + $0x14] sm:$0xf]  ;;  %v727_v41 = vrot.slane %v726_v36, 4  ;;  %v793_v1 = vsel %vm2089_vm1, %v776_v0, 0  ;;  %v961_v8 = vpop.permute.xlu1 %960 }
  0xb4   : > { %851 = vrot.lane.b32.xlu0 %v2040_v27, %s1786_s27  ;;  %v624_v29 = vsel %vm1981_vm4, %v2040_v27, 0  ;;  %v651_v42 = vsel %vm2051_vm12, %v632_v40, 0  ;;  %v650_v43 = vsel %vm646_vm10, %v2040_v27, 0  ;;  %v652_v47 = vsel %vm646_vm10, %v2049_v34, 0  ;;  %v695_v55 = vld [vmem:[#allocation2 + $0x14] sm:$0xf] }
  0xb5   : > { %v1591_v30 = vcombine.high %v623_v28, %v624_v29  ;;  %v1590_v31 = vcombine.low %v623_v28, %v624_v29  ;;  %v729_v45 = vsel %vm728_vm13, %v727_v41, %v726_v36  ;;  %v2071_v48 = vsel %vm1981_vm4, %v2049_v34, 0  ;;  %v778_v4 = vld [vmem:[#allocation2 + $0x14] sm:$0xf]  ;;  %v939_v28 = vld [vmem:[#allocation2 + $0x8] sm:$0xf] }
  0xb6   : > { %v840_v33 = vld [vmem:[#allocation2 + $0x20] sm:$0xf]  ;;  %vm730_vm14 = vcmp.ne.s16.totalorder %v729_v45, 0  ;;  %vm2073_vm15 = vcmp.ne.s16.totalorder %v727_v41, 0  ;;  %vm788_vm4 = vcmask 130048   ;;  %v889_v63 = vpop.permute.xlu0 %888  ;;  %v795_v5 = vsel %vm2089_vm1, %v778_v4, 0 }
  0xb7   : > { %1366 = vmatprep.subr.bf16.mxu0 %v1591_v30  ;;  %1635 = vmatprep.subr.bf16.mxu1 %v1591_v30  ;;  %v634_v44 = vld [vmem:[#allocation2 + $0x20] sm:$0xf]  ;;  %v733_v52 = vsel %vm2073_vm15, %v693_v51, 0  ;;  %v732_v53 = vsel %vm730_vm14, %v2036_v24, 0  ;;  %v735_v56 = vsel %vm2073_vm15, %v695_v55, 0  ;;  %v734_v57 = vsel %vm730_vm14, %v2040_v27, 0  ;;  %v1095_v41 = vpop.permute.xlu1 %1094 }
  0xb8   : > { %1367 = vmatpush1.bf16.msra.mxu0 %v1590_v31  ;;  %1649 = vmatpush1.bf16.msra.mxu1 %v1590_v31  ;;  %v653_v46 = vsel %vm2051_vm12, %v634_v44, 0  ;;  %v697_v58 = vld [vmem:[#allocation2 + $0x20] sm:$0xf]  ;;  %v789_v59 = vsel %vm788_vm4, %v787_v54, %v786_v50  ;;  %v736_v61 = vsel %vm730_vm14, %v2049_v34, 0  ;;  %v890_v3 = vrot.slane %v889_v63, 4 }
  0xb9   : > { %855 = vrot.lane.b32.xlu0 %v2049_v34, %s1786_s27  ;;  %857 = vrot.lane.b32.xlu1 %v840_v33, %s1786_s27  ;;  %v737_v60 = vsel %vm2073_vm15, %v697_v58, 0  ;;  %vm790_vm0 = vcmp.ne.s16.totalorder %v789_v59, 0  ;;  %v780_v7 = vld [vmem:[#allocation2 + $0x20] sm:$0xf]  ;;  %v962_v16 = vrot.slane %v961_v8, 4  ;;  %v1096_v45 = vrot.slane %v1095_v41, 4 }
  0xba   : > { %v792_v2 = vsel %vm790_vm0, %v2036_v24, 0  ;;  %v794_v6 = vsel %vm790_vm0, %v2040_v27, 0  ;;  %v892_v9 = vsel %vm891_vm2, %v890_v3, %v889_v63  ;;  %v797_v10 = vsel %vm2089_vm1, %v780_v7, 0  ;;  %v881_v17 = vld [vmem:[#allocation2 + $0x14] sm:$0xf]  ;;  %v1023_v26 = vpop.permute.xlu0 %1022 }
  0xbb   : > { %v796_v11 = vsel %vm790_vm0, %v2049_v34, 0  ;;  %vm893_vm5 = vcmp.ne.s16.totalorder %v892_v9, 0  ;;  %vm2105_vm3 = vcmp.ne.s16.totalorder %v890_v3, 0  ;;  %v964_v20 = vsel %vm963_vm7, %v962_v16, %v961_v8  ;;  %v883_v21 = vld [vmem:[#allocation2 + $0x20] sm:$0xf] }
  0xbc   : > { %v896_v14 = vsel %vm2105_vm3, %v879_v13, 0  ;;  %v895_v15 = vsel %vm893_vm5, %v2036_v24, 0  ;;  %v898_v18 = vsel %vm2105_vm3, %v881_v17, 0  ;;  %v897_v19 = vsel %vm893_vm5, %v2040_v27, 0  ;;  %v941_v32 = vld [vmem:[#allocation2 + $0x14] sm:$0xf] }
  0xbd   : > { %662 = vrot.lane.b32.xlu1 %v649_v38, %s1787_s29  ;;  %660 = vrot.lane.b32.xlu0 %v648_v39, %s1787_s29  ;;  %v900_v22 = vsel %vm2105_vm3, %v883_v21, 0  ;;  %v899_v23 = vsel %vm893_vm5, %v2049_v34, 0  ;;  %vm965_vm8 = vcmp.ne.s16.totalorder %v964_v20, 0  ;;  %vm2121_vm6 = vcmp.ne.s16.totalorder %v962_v16, 0  ;;  %v943_v37 = vld [vmem:[#allocation2 + $0x20] sm:$0xf] }
  0xbe   : > { %v968_v29 = vsel %vm2121_vm6, %v939_v28, 0  ;;  %v967_v30 = vsel %vm965_vm8, %v2036_v24, 0  ;;  %v1024_v31 = vrot.slane %v1023_v26, 4  ;;  %v970_v33 = vsel %vm2121_vm6, %v941_v32, 0  ;;  %v1015_v51 = vld [vmem:[#allocation2 + $0x20] sm:$0xf] }
  0xbf   : > { %v969_v35 = vsel %vm965_vm8, %v2040_v27, 0  ;;  %v972_v38 = vsel %vm2121_vm6, %v943_v37, 0  ;;  %v971_v39 = vsel %vm965_vm8, %v2049_v34, 0  ;;  %vm1097_vm12 = vcmask 277504   ;;  %v1073_v55 = vld [vmem:[#allocation2 + $0x8] sm:$0xf] }
  0xc0   : > { %v1026_v36 = vsel %vm1025_vm11, %v1024_v31, %v1023_v26  ;;  %vm2137_vm10 = vcmp.ne.s16.totalorder %v1024_v31, 0  ;;  %v1098_v50 = vsel %vm1097_vm12, %v1096_v45, %v1095_v41  ;;  %vm2153_vm14 = vcmp.ne.s16.totalorder %v1096_v45, 0  ;;  %v1075_v58 = vld [vmem:[#allocation2 + $0x14] sm:$0xf]  ;;  %v1732_v59 = vld [vmem:[%s2287_s4 + $0x4] ss:$8 sps:$4 sm:$0xff]  }
  0xc1   : > { %666 = vrot.lane.b32.xlu1 %v651_v42, %s1787_s29  ;;  %664 = vrot.lane.b32.xlu0 %v650_v43, %s1787_s29  ;;  %vm1027_vm9 = vcmp.ne.s16.totalorder %v1026_v36, 0  ;;  %v1011_v42 = vld [vmem:[#allocation2 + $0x8] sm:$0xf]  ;;  %vm1099_vm13 = vcmp.ne.s16.totalorder %v1098_v50, 0  ;;  %vm1352_vm15 = vcmask 719872   ;;  %vm680_vm4 = vcmask 1039360  }
  0xc2   : > { %v1030_v43 = vsel %vm2137_vm10, %v1011_v42, 0  ;;  %v1029_v44 = vsel %vm1027_vm9, %v2036_v24, 0  ;;  %v1031_v49 = vsel %vm1027_vm9, %v2040_v27, 0  ;;  %1619 = vmatprep.mubr.msk.bf16.mxu0 %vm1352_vm15, %v1732_v59  ;;  %1620 = vmatprep.mubr.msk.bf16.mxu1 %vm1352_vm15, %v1735_v62  ;;  %v1105_v0 = vsel %vm1099_vm13, %v2049_v34, 0 }
  0xc3   : > { %vm678_vm0 = vcmask 1043456   ;;  %vm763_vm1 = vcmask 1031168   ;;  %vm823_vm2 = vcmask 916480   ;;  %vm866_vm5 = vcmask 908288  }
  0xc4   : > { %vm926_vm3 = vcmask 900096   ;;  %vm998_vm7 = vcmask 785408   ;;  %vm1060_vm8 = vcmask 777216   ;;  %vm1132_vm6 = vcmask 769024  }
  0xc5   : > { %670 = vrot.lane.b32.xlu1 %v653_v46, %s1787_s29  ;;  %668 = vrot.lane.b32.xlu0 %v652_v47, %s1787_s29  ;;  %v1013_v46 = vld [vmem:[#allocation2 + $0x14] sm:$0xf] }
  0xc6   : > { %v1032_v47 = vsel %vm2137_vm10, %v1013_v46, 0 }
  0xc9   : > { %746 = vrot.lane.b32.xlu1 %v733_v52, %s1788_s7  ;;  %744 = vrot.lane.b32.xlu0 %v732_v53, %s1788_s7  ;;  %v1034_v52 = vsel %vm2137_vm10, %v1015_v51, 0  ;;  %v1033_v53 = vsel %vm1027_vm9, %v2049_v34, 0  ;;  %v1178_v34 = vld [vmem:[%s2288_s5 + $0x18] sm:$0xff] }
  0xcd   : > { %750 = vrot.lane.b32.xlu1 %v735_v56, %s1788_s7  ;;  %748 = vrot.lane.b32.xlu0 %v734_v57, %s1788_s7  ;;  %v1102_v56 = vsel %vm2153_vm14, %v1073_v55, 0  ;;  %v1101_v57 = vsel %vm1099_vm13, %v2036_v24, 0  ;;  %v1077_v24 = vld [vmem:[#allocation2 + $0x20] sm:$0xf] }
  0xce   : > { %v1106_v63 = vsel %vm2153_vm14, %v1077_v24, 0 }
  0xd1   : > { %754 = vrot.lane.b32.xlu1 %v737_v60, %s1788_s7  ;;  %752 = vrot.lane.b32.xlu0 %v736_v61, %s1788_s7  ;;  %v1104_v60 = vsel %vm2153_vm14, %v1075_v58, 0  ;;  %v1103_v61 = vsel %vm1099_vm13, %v2040_v27, 0  ;;  %v1176_v27 = vld [vmem:[%s2288_s5 + $0x8] sm:$0xff] }
  0xd5   : > { %806 = vrot.lane.b32.xlu1 %v793_v1, %s1789_s8  ;;  %804 = vrot.lane.b32.xlu0 %v792_v2, %s1789_s8  ;;  %v1175_v1 = vld [vmem:[%s2288_s5] sm:$0xff]  ;;  %v1177_v2 = vld [vmem:[%s2288_s5 + $0x10] sm:$0xff] }
  0xd9   : > { %810 = vrot.lane.b32.xlu1 %v795_v5, %s1789_s8  ;;  %808 = vrot.lane.b32.xlu0 %v794_v6, %s1789_s8 }
  0xdd   : > { %814 = vrot.lane.b32.xlu1 %v797_v10, %s1789_s8  ;;  %812 = vrot.lane.b32.xlu0 %v796_v11, %s1789_s8 }
  0xe1   : > { %909 = vrot.lane.b32.xlu1 %v896_v14, %s1790_s21  ;;  %907 = vrot.lane.b32.xlu0 %v895_v15, %s1790_s21 }
  0xe5   : > { %913 = vrot.lane.b32.xlu1 %v898_v18, %s1790_s21  ;;  %911 = vrot.lane.b32.xlu0 %v897_v19, %s1790_s21 }
  0xe9   : > { %917 = vrot.lane.b32.xlu1 %v900_v22, %s1790_s21  ;;  %915 = vrot.lane.b32.xlu0 %v899_v23, %s1790_s21 }
  0xed   : > { %981 = vrot.lane.b32.xlu1 %v968_v29, %s1791_s9  ;;  %979 = vrot.lane.b32.xlu0 %v967_v30, %s1791_s9 }
  0xf1   : > { %985 = vrot.lane.b32.xlu1 %v970_v33, %s1791_s9  ;;  %983 = vrot.lane.b32.xlu0 %v969_v35, %s1791_s9 }
  0xf5   : > { %989 = vrot.lane.b32.xlu1 %v972_v38, %s1791_s9  ;;  %987 = vrot.lane.b32.xlu0 %v971_v39, %s1791_s9 }
  0xf9   : > { %1043 = vrot.lane.b32.xlu1 %v1030_v43, %s1792_s10  ;;  %1041 = vrot.lane.b32.xlu0 %v1029_v44, %s1792_s10 }
  0xfd   : > { %1047 = vrot.lane.b32.xlu1 %v1032_v47, %s1792_s10  ;;  %1045 = vrot.lane.b32.xlu0 %v1031_v49, %s1792_s10 }
 0x101   : > { %1051 = vrot.lane.b32.xlu1 %v1034_v52, %s1792_s10  ;;  %1049 = vrot.lane.b32.xlu0 %v1033_v53, %s1792_s10  ;;  %s1625_s10 = sshll.u32 %s2326_s23, 6 }
 0x102   : > { %s472_s13 = scalar_lea.vmem %s2289_s6, %s1625_s10 }
 0x105   : > { %1115 = vrot.lane.b32.xlu1 %v1102_v56, %s1793_s11  ;;  %1113 = vrot.lane.b32.xlu0 %v1101_v57, %s1793_s11 }
 0x109   : > { %1119 = vrot.lane.b32.xlu1 %v1104_v60, %s1793_s11  ;;  %1117 = vrot.lane.b32.xlu0 %v1103_v61, %s1793_s11 }
 0x10d   : > { %1123 = vrot.lane.b32.xlu1 %v1106_v63, %s1793_s11  ;;  %1121 = vrot.lane.b32.xlu0 %v1105_v0, %s1793_s11 }
 0x111   : > { %1186 = vperm.xlu1 %1729, %v1176_v27   ;;  %1181 = vperm.xlu0 %1728, %v1175_v1  }
 0x115   : > { %1191 = vperm.xlu1 %1729, %v1177_v2   ;;  %1196 = vperm.xlu0 %1728, %v1178_v34  }
 0x121   : > { %v2187_v3 = vpop.permute.xlu1 %849 }
 0x122   : > { %v2189_v4 = vpop.permute.xlu0 %847  ;;  %v860_v2 = vrot.slane %v2187_v3, 4 }
 0x123   : > { %v859_v34 = vrot.slane %v2189_v4, 4 }
 0x125   : > { %v2191_v5 = vpop.permute.xlu1 %853 }
 0x126   : > { %v2193_v6 = vpop.permute.xlu0 %851  ;;  %v862_v59 = vrot.slane %v2191_v5, 4 }
 0x127   : > { %v861_v58 = vrot.slane %v2193_v6, 4 }
 0x12b   : > { %v2195_v7 = vpop.permute.xlu0 %855  ;;  %v2197_v9 = vpop.permute.xlu1 %857 }
 0x12c   : > { %v864_v3 = vrot.slane %v2197_v9, 4 }
 0x12f   : > { %v661_v10 = vpop.permute.xlu0 %660  ;;  %v663_v11 = vpop.permute.xlu1 %662 }
 0x130   : > { %v672_v12 = vrot.slane %v661_v10, 4  ;;  %v673_v8 = vrot.slane %v663_v11, 4  ;;  %v868_v11 = vsel %vm678_vm0, %v861_v58, %v862_v59 }
 0x132   : > { %v679_v13 = vsel %vm678_vm0, %v672_v12, %v673_v8 }
 0x133   : > { %v665_v14 = vpop.permute.xlu0 %664  ;;  %v667_v15 = vpop.permute.xlu1 %666  ;;  %v681_v16 = vsel %vm680_vm4, %v661_v10, %v679_v13 }
 0x134   : > { %v674_v17 = vrot.slane %v665_v14, 4  ;;  %v675_v18 = vrot.slane %v667_v15, 4  ;;  %v1593_v19 = vcombine.high %v2071_v48, %v681_v16  ;;  %v1592_v20 = vcombine.low %v2071_v48, %v681_v16 }
 0x135   : > { %v863_v15 = vrot.slane %v2195_v7, 4 }
 0x136   : > { %1368 = vmatprep.subr.bf16.mxu0 %v1593_v19  ;;  %1636 = vmatprep.subr.bf16.mxu1 %v1593_v19  ;;  %v682_v23 = vsel %vm678_vm0, %v674_v17, %v675_v18 }
 0x137   : > { %v669_v21 = vpop.permute.xlu0 %668  ;;  %1369 = vmatpush1.bf16.msra.mxu0 %v1592_v20  ;;  %1650 = vmatpush1.bf16.msra.mxu1 %v1592_v20  ;;  %v671_v22 = vpop.permute.xlu1 %670  ;;  %v683_v31 = vsel %vm680_vm4, %v665_v14, %v682_v23  ;;  %v865_v14 = vsel %vm678_vm0, %v859_v34, %v860_v2  ;;  %v870_v9 = vsel %vm678_vm0, %v863_v15, %v864_v3 }
 0x138   : > { %v676_v25 = vrot.slane %v669_v21, 4  ;;  %v677_v26 = vrot.slane %v671_v22, 4 }
 0x13a   : > { %v684_v28 = vsel %vm678_vm0, %v676_v25, %v677_v26 }
 0x13b   : > { %v745_v29 = vpop.permute.xlu0 %744  ;;  %v747_v30 = vpop.permute.xlu1 %746  ;;  %v685_v32 = vsel %vm680_vm4, %v669_v21, %v684_v28  ;;  %v869_v21 = vsel %vm866_vm5, %v2193_v6, %v868_v11  ;;  %v867_v28 = vsel %vm866_vm5, %v2189_v4, %v865_v14  ;;  %v871_v4 = vsel %vm866_vm5, %v2195_v7, %v870_v9 }
 0x13c   : > { %v756_v33 = vrot.slane %v745_v29, 4  ;;  %v757_v48 = vrot.slane %v747_v30, 4  ;;  %v1595_v35 = vcombine.high %v683_v31, %v685_v32  ;;  %v1594_v36 = vcombine.low %v683_v31, %v685_v32 }
 0x13d   : > { %v1603_v30 = vcombine.high %v867_v28, %v869_v21 }
 0x13e   : > { %1370 = vmatprep.subr.bf16.mxu0 %v1595_v35  ;;  %1637 = vmatprep.subr.bf16.mxu1 %v1595_v35  ;;  %v762_v39 = vsel %vm678_vm0, %v756_v33, %v757_v48  ;;  %v1602_v35 = vcombine.low %v867_v28, %v869_v21 }
 0x13f   : > { %v749_v37 = vpop.permute.xlu0 %748  ;;  %1371 = vmatpush1.bf16.msra.mxu0 %v1594_v36  ;;  %1651 = vmatpush1.bf16.msra.mxu1 %v1594_v36  ;;  %v751_v38 = vpop.permute.xlu1 %750  ;;  %v764_v45 = vsel %vm763_vm1, %v745_v29, %v762_v39 }
 0x140   : > { %v758_v40 = vrot.slane %v749_v37, 4  ;;  %v759_v41 = vrot.slane %v751_v38, 4 }
 0x142   : > { %v765_v42 = vsel %vm678_vm0, %v758_v40, %v759_v41 }
 0x143   : > { %v753_v43 = vpop.permute.xlu0 %752  ;;  %v755_v44 = vpop.permute.xlu1 %754  ;;  %v766_v46 = vsel %vm763_vm1, %v749_v37, %v765_v42 }
 0x144   : > { %v760_v47 = vrot.slane %v753_v43, 4  ;;  %v761_v49 = vrot.slane %v755_v44, 4  ;;  %v1597_v50 = vcombine.high %v764_v45, %v766_v46  ;;  %v1596_v51 = vcombine.low %v764_v45, %v766_v46 }
 0x146   : > { %1372 = vmatprep.subr.bf16.mxu0 %v1597_v50  ;;  %1638 = vmatprep.subr.bf16.mxu1 %v1597_v50  ;;  %v767_v54 = vsel %vm678_vm0, %v760_v47, %v761_v49 }
 0x147   : > { %v805_v52 = vpop.permute.xlu0 %804  ;;  %1373 = vmatpush1.bf16.msra.mxu0 %v1596_v51  ;;  %1652 = vmatpush1.bf16.msra.mxu1 %v1596_v51  ;;  %v807_v53 = vpop.permute.xlu1 %806  ;;  %v768_v62 = vsel %vm763_vm1, %v753_v43, %v767_v54 }
 0x148   : > { %v816_v55 = vrot.slane %v805_v52, 4  ;;  %v817_v56 = vrot.slane %v807_v53, 4 }
 0x14a   : > { %v822_v57 = vsel %vm678_vm0, %v816_v55, %v817_v56 }
 0x14b   : > { %v809_v60 = vpop.permute.xlu0 %808  ;;  %v811_v61 = vpop.permute.xlu1 %810  ;;  %v824_v24 = vsel %vm823_vm2, %v805_v52, %v822_v57 }
 0x14c   : > { %v818_v63 = vrot.slane %v809_v60, 4  ;;  %v819_v0 = vrot.slane %v811_v61, 4  ;;  %v1599_v27 = vcombine.high %v768_v62, %v824_v24  ;;  %v1598_v1 = vcombine.low %v768_v62, %v824_v24 }
 0x14e   : > { %1374 = vmatprep.subr.bf16.mxu0 %v1599_v27  ;;  %1639 = vmatprep.subr.bf16.mxu1 %v1599_v27  ;;  %v825_v12 = vsel %vm678_vm0, %v818_v63, %v819_v0 }
 0x14f   : > { %v813_v10 = vpop.permute.xlu0 %812  ;;  %1375 = vmatpush1.bf16.msra.mxu0 %v1598_v1  ;;  %1653 = vmatpush1.bf16.msra.mxu1 %v1598_v1  ;;  %v815_v5 = vpop.permute.xlu1 %814  ;;  %v826_v19 = vsel %vm823_vm2, %v809_v60, %v825_v12 }
 0x150   : > { %v820_v8 = vrot.slane %v813_v10, 4  ;;  %v821_v13 = vrot.slane %v815_v5, 4 }
 0x152   : > { %v827_v16 = vsel %vm678_vm0, %v820_v8, %v821_v13 }
 0x153   : > { %v908_v17 = vpop.permute.xlu0 %907  ;;  %v910_v18 = vpop.permute.xlu1 %909  ;;  %v828_v20 = vsel %vm823_vm2, %v813_v10, %v827_v16 }
 0x154   : > { %v919_v22 = vrot.slane %v908_v17, 4  ;;  %v920_v23 = vrot.slane %v910_v18, 4  ;;  %v1601_v25 = vcombine.high %v826_v19, %v828_v20  ;;  %v1600_v26 = vcombine.low %v826_v19, %v828_v20 }
 0x156   : > { %v925_v29 = vsel %vm678_vm0, %v919_v22, %v920_v23  ;;  %1376 = vmatprep.subr.bf16.mxu0 %v1601_v25  ;;  %1640 = vmatprep.subr.bf16.mxu1 %v1601_v25 }
 0x157   : > { %v912_v31 = vpop.permute.xlu0 %911  ;;  %1377 = vmatpush1.bf16.msra.mxu0 %v1600_v26  ;;  %1654 = vmatpush1.bf16.msra.mxu1 %v1600_v26  ;;  %v914_v32 = vpop.permute.xlu1 %913  ;;  %v927_v6 = vsel %vm926_vm3, %v908_v17, %v925_v29 }
 0x158   : > { %v921_v33 = vrot.slane %v912_v31, 4  ;;  %v922_v48 = vrot.slane %v914_v32, 4  ;;  %1378 = vmatprep.subr.bf16.mxu0 %v1603_v30  ;;  %1641 = vmatprep.subr.bf16.mxu1 %v1603_v30  ;;  %v1605_v36 = vcombine.high %v871_v4, %v927_v6  ;;  %v1604_v42 = vcombine.low %v871_v4, %v927_v6 }
 0x15a   : > { %v928_v39 = vsel %vm678_vm0, %v921_v33, %v922_v48 }
 0x15b   : > { %v916_v37 = vpop.permute.xlu0 %915  ;;  %1379 = vmatpush1.bf16.msra.mxu0 %v1602_v35  ;;  %1655 = vmatpush1.bf16.msra.mxu1 %v1602_v35  ;;  %v918_v38 = vpop.permute.xlu1 %917  ;;  %v929_v7 = vsel %vm926_vm3, %v912_v31, %v928_v39 }
 0x15c   : > { %v923_v40 = vrot.slane %v916_v37, 4  ;;  %v924_v41 = vrot.slane %v918_v38, 4  ;;  %1380 = vmatprep.subr.bf16.mxu0 %v1605_v36  ;;  %1642 = vmatprep.subr.bf16.mxu1 %v1605_v36 }
 0x15e   : > { %v930_v43 = vsel %vm678_vm0, %v923_v40, %v924_v41 }
 0x15f   : > { %v980_v44 = vpop.permute.xlu0 %979  ;;  %1381 = vmatpush1.bf16.msra.mxu0 %v1604_v42  ;;  %1656 = vmatpush1.bf16.msra.mxu1 %v1604_v42  ;;  %v982_v45 = vpop.permute.xlu1 %981  ;;  %v931_v46 = vsel %vm926_vm3, %v916_v37, %v930_v43 }
 0x160   : > { %v991_v47 = vrot.slane %v980_v44, 4  ;;  %v992_v49 = vrot.slane %v982_v45, 4  ;;  %v1607_v50 = vcombine.high %v929_v7, %v931_v46  ;;  %v1606_v51 = vcombine.low %v929_v7, %v931_v46 }
 0x162   : > { %1382 = vmatprep.subr.bf16.mxu0 %v1607_v50  ;;  %1643 = vmatprep.subr.bf16.mxu1 %v1607_v50  ;;  %v997_v54 = vsel %vm678_vm0, %v991_v47, %v992_v49  ;;  %v1730_v49 = vld [vmem:[%s2287_s4] ss:$8 sps:$4 sm:$0xff]   ;;  %v1733_v50 = vld [vmem:[%s2287_s4 + $0x10] ss:$8 sps:$4 sm:$0xff]  }
 0x163   : > { %v984_v52 = vpop.permute.xlu0 %983  ;;  %1383 = vmatpush1.bf16.msra.mxu0 %v1606_v51  ;;  %1657 = vmatpush1.bf16.msra.mxu1 %v1606_v51  ;;  %v986_v53 = vpop.permute.xlu1 %985  ;;  %v999_v60 = vsel %vm998_vm7, %v980_v44, %v997_v54 }
 0x164   : > { %v993_v55 = vrot.slane %v984_v52, 4  ;;  %v994_v56 = vrot.slane %v986_v53, 4 }
 0x166   : > { %v1000_v57 = vsel %vm678_vm0, %v993_v55, %v994_v56 }
 0x167   : > { %v988_v58 = vpop.permute.xlu0 %987  ;;  %v990_v59 = vpop.permute.xlu1 %989  ;;  %v1001_v61 = vsel %vm998_vm7, %v984_v52, %v1000_v57 }
 0x168   : > { %v995_v62 = vrot.slane %v988_v58, 4  ;;  %v996_v24 = vrot.slane %v990_v59, 4  ;;  %v1609_v63 = vcombine.high %v999_v60, %v1001_v61  ;;  %v1608_v0 = vcombine.low %v999_v60, %v1001_v61 }
 0x16a   : > { %1384 = vmatprep.subr.bf16.mxu0 %v1609_v63  ;;  %1644 = vmatprep.subr.bf16.mxu1 %v1609_v63  ;;  %v1002_v2 = vsel %vm678_vm0, %v995_v62, %v996_v24 }
 0x16b   : > { %v1042_v27 = vpop.permute.xlu0 %1041  ;;  %1385 = vmatpush1.bf16.msra.mxu0 %v1608_v0  ;;  %1658 = vmatpush1.bf16.msra.mxu1 %v1608_v0  ;;  %v1044_v1 = vpop.permute.xlu1 %1043  ;;  %v1003_v8 = vsel %vm998_vm7, %v988_v58, %v1002_v2 }
 0x16c   : > { %v1053_v34 = vrot.slane %v1042_v27, 4  ;;  %v1054_v10 = vrot.slane %v1044_v1, 4 }
 0x16e   : > { %v1059_v5 = vsel %vm678_vm0, %v1053_v34, %v1054_v10 }
 0x16f   : > { %v1046_v11 = vpop.permute.xlu0 %1045  ;;  %v1048_v12 = vpop.permute.xlu1 %1047  ;;  %v1061_v13 = vsel %vm1060_vm8, %v1042_v27, %v1059_v5 }
 0x170   : > { %v1055_v14 = vrot.slane %v1046_v11, 4  ;;  %v1056_v15 = vrot.slane %v1048_v12, 4  ;;  %v1611_v3 = vcombine.high %v1003_v8, %v1061_v13  ;;  %v1610_v16 = vcombine.low %v1003_v8, %v1061_v13 }
 0x172   : > { %1386 = vmatprep.subr.bf16.mxu0 %v1611_v3  ;;  %1645 = vmatprep.subr.bf16.mxu1 %v1611_v3  ;;  %v1062_v19 = vsel %vm678_vm0, %v1055_v14, %v1056_v15 }
 0x173   : > { %v1050_v17 = vpop.permute.xlu0 %1049  ;;  %1387 = vmatpush1.bf16.msra.mxu0 %v1610_v16  ;;  %1659 = vmatpush1.bf16.msra.mxu1 %v1610_v16  ;;  %v1052_v18 = vpop.permute.xlu1 %1051  ;;  %v1063_v26 = vsel %vm1060_vm8, %v1046_v11, %v1062_v19 }
 0x174   : > { %v1057_v20 = vrot.slane %v1050_v17, 4  ;;  %v1058_v21 = vrot.slane %v1052_v18, 4 }
 0x176   : > { %v1064_v22 = vsel %vm678_vm0, %v1057_v20, %v1058_v21 }
 0x177   : > { %v1114_v23 = vpop.permute.xlu0 %1113  ;;  %v1116_v25 = vpop.permute.xlu1 %1115  ;;  %v1065_v28 = vsel %vm1060_vm8, %v1050_v17, %v1064_v22 }
 0x178   : > { %v1125_v9 = vrot.slane %v1114_v23, 4  ;;  %v1126_v29 = vrot.slane %v1116_v25, 4  ;;  %v1613_v30 = vcombine.high %v1063_v26, %v1065_v28  ;;  %v1612_v31 = vcombine.low %v1063_v26, %v1065_v28 }
 0x17a   : > { %1388 = vmatprep.subr.bf16.mxu0 %v1613_v30  ;;  %1646 = vmatprep.subr.bf16.mxu1 %v1613_v30  ;;  %v1131_v33 = vsel %vm678_vm0, %v1125_v9, %v1126_v29 }
 0x17b   : > { %v1118_v32 = vpop.permute.xlu0 %1117  ;;  %1389 = vmatpush1.bf16.msra.mxu0 %v1612_v31  ;;  %1660 = vmatpush1.bf16.msra.mxu1 %v1612_v31  ;;  %v1120_v6 = vpop.permute.xlu1 %1119  ;;  %v1133_v38 = vsel %vm1132_vm6, %v1114_v23, %v1131_v33 }
 0x17c   : > { %v1127_v48 = vrot.slane %v1118_v32, 4  ;;  %v1128_v35 = vrot.slane %v1120_v6, 4 }
 0x17e   : > { %v1134_v4 = vsel %vm678_vm0, %v1127_v48, %v1128_v35 }
 0x17f   : > { %v1122_v36 = vpop.permute.xlu0 %1121  ;;  %v1124_v37 = vpop.permute.xlu1 %1123  ;;  %v1135_v39 = vsel %vm1132_vm6, %v1118_v32, %v1134_v4 }
 0x180   : > { %v1129_v40 = vrot.slane %v1122_v36, 4  ;;  %v1130_v41 = vrot.slane %v1124_v37, 4  ;;  %v1615_v42 = vcombine.high %v1133_v38, %v1135_v39  ;;  %v1614_v43 = vcombine.low %v1133_v38, %v1135_v39 }
 0x182   : > { %v1136_v44 = vsel %vm678_vm0, %v1129_v40, %v1130_v41  ;;  %1390 = vmatprep.subr.bf16.mxu0 %v1615_v42  ;;  %1647 = vmatprep.subr.bf16.mxu1 %v1615_v42 }
 0x183   : > { %v1137_v45 = vsel %vm1132_vm6, %v1122_v36, %v1136_v44  ;;  %1391 = vmatpush1.bf16.msra.mxu0 %v1614_v43  ;;  %1661 = vmatpush1.bf16.msra.mxu1 %v1614_v43 }
 0x184   : > { %v1617_v7 = vcombine.high %v1137_v45, %v1137_v45  ;;  %v1616_v46 = vcombine.low %v1137_v45, %v1137_v45 }
 0x186   : > { %1618 = vmatprep.subr.msk.bf16.mxu0 %vm678_vm0, %v1617_v7  ;;  %1648 = vmatprep.subr.msk.bf16.mxu1 %vm678_vm0, %v1617_v7  ;;  %v1361_v47 = vsel %vm678_vm0, %v1616_v46, 0 }
 0x187   : > { %1393 = vmatpush1.bf16.msra.mxu0 %v1361_v47  ;;  %1662 = vmatpush1.bf16.msra.mxu1 %v1361_v47 }
 0x18a   : > { %1399 = vmatmul.mubr.bf16.vlgmr.msra.gmra.mrb[0].mxu0 %v1730_v49  ;;  %1409 = vmatmul.mubr.bf16.vlgmr.msra.gmra.mrb[0].mxu1 %v1733_v50 }
 0x190   : > { %v1187_v51 = vpop.permute.xlu1 %1186  ;;  %v1182_v52 = vpop.permute.xlu0 %1181 }
 0x194   : > { %v1192_v53 = vpop.permute.xlu1 %1191  ;;  %v1197_v54 = vpop.permute.xlu0 %1196 }
 0x25d   : > { %v1400_v55 = vpop.f32.mrb[0].mxu0  ;;  %v1410_v56 = vpop.f32.mrb[0].mxu1 }
 0x25e   : > { %v1401_v57 = vadd.f32 %v1400_v55, %v1182_v52  ;;  %v1411_v58 = vadd.f32 %v1410_v56, %v1192_v53  ;;  %v1402_v59 = vpop.f32.mrb[1].mxu0  ;;  %v1412_v60 = vpop.f32.mrb[1].mxu1 }
 0x25f   : > { %v1403_v61 = vadd.f32 %v1402_v59, %v1182_v52  ;;  %v1413_v62 = vadd.f32 %v1412_v60, %v1192_v53  ;;  %v1404_v24 = vpop.f32.mrb[2].mxu0  ;;  %v1414_v63 = vpop.f32.mrb[2].mxu1 }
 0x260   : > { %1419 = vst [vmem:[%s472_s13] sm:$0xff] %v1401_v57  ;;  %1423 = vst [vmem:[%s472_s13 + $0x20] sm:$0xff] %v1411_v58  ;;  %v1405_v0 = vadd.f32 %v1404_v24, %v1187_v51  ;;  %v1415_v27 = vadd.f32 %v1414_v63, %v1197_v54  ;;  %v1406_v1 = vpop.f32.mrb[3].mxu0  ;;  %v1416_v2 = vpop.f32.mrb[3].mxu1 }
 0x261   : > { %1420 = vst [vmem:[%s472_s13 + $0x8] sm:$0xff] %v1403_v61  ;;  %1424 = vst [vmem:[%s472_s13 + $0x28] sm:$0xff] %v1413_v62  ;;  %v1407_v34 = vadd.f32 %v1406_v1, %v1187_v51  ;;  %v1417_v10 = vadd.f32 %v1416_v2, %v1197_v54 }
 0x262   : > { %1421 = vst [vmem:[%s472_s13 + $0x10] sm:$0xff] %v1405_v0  ;;  %1425 = vst [vmem:[%s472_s13 + $0x30] sm:$0xff] %v1415_v27 }
 0x263   : > { %1422 = vst [vmem:[%s472_s13 + $0x18] sm:$0xff] %v1407_v34  ;;  %1426 = vst [vmem:[%s472_s13 + $0x38] sm:$0xff] %v1417_v10 }
 0x264 PF: > { %s16_s25 = sadd.s32 1, %s1774_s25   ;;  %s2319_s21 = smov %s1762_s22 }
 0x265   : > { %p13_p10 = scmp.ge.s32.totalorder %s16_s25, 4   ;;  %s2320_s22 = smov %s1868_s30 }
 0x266   : > { %s2321_s23 = smov %s1770_s24  ;;  %s2322_s24 = smov %s2324_s26 }
 0x267   :  { %15 = sbr.rel (!%p13_p10) target bundleno = 3 (0x3), region = 169 }

</bundles_post_ra>
